<compile_context>
chip_gen: v5e
topology: v5e:2x2
jax: 0.10.0
libtpu: 0.0.40
codegen_flags: <defaults>
</compile_context>

<pallas_src>
import jax
import jax.numpy as jnp
from jax.experimental import pallas as pl
from jax.experimental.pallas import tpu as pltpu

EPSILON = 1e-10

_LANES = 512                     # lane-dense last dim (multiple of 128)
_TILE_ROWS = 2048                # (2048, 512) f32 block = 4 MiB per buffer
_TILE_1D = 1024 * 1024           # 1 Mi elements = 4 MiB f32 per buffer (ragged path)
_VMEM_LIMIT = 48 * 1024 * 1024   # > v5e 16 MiB scoped default, < v7x 64 MiB physical


def _round_up(a: int, m: int) -> int:
    return ((a + m - 1) // m) * m


def _step_kernel(x_ref, o_ref):
    # Elementwise on the VPU; in-kernel cast is free (hidden under DMA).
    x = x_ref[...].astype(jnp.float32)
    o_ref[...] = (x + EPSILON >= 0.0).astype(jnp.float32)


def _compiler_params():
    return pltpu.CompilerParams(
        dimension_semantics=("parallel",),
        vmem_limit_bytes=_VMEM_LIMIT,
    )


def _cost(n: int, in_itemsize: int):
    # Advisory estimate so XLA schedules neighbors around the custom call.
    return pl.CostEstimate(
        flops=2 * n, transcendentals=0, bytes_accessed=n * in_itemsize + n * 4
    )


def _step_2d(x2d: jax.Array) -> jax.Array:
    """Lane-dense (rows, 512) streaming pass (zero-copy path)."""
    rows, _ = x2d.shape
    itemsize = jnp.dtype(x2d.dtype).itemsize
    # Minimal sublane multiple for this dtype's packing (f32/bf16/int8).
    sub = {4: 8, 2: 16, 1: 32}.get(itemsize, 8)
    if rows < 2 * sub:
        tile_rows = rows                              # single full-extent block
    else:
        # >= 2 grid steps (megacore on v7x), capped at the 4 MiB block.
        tile_rows = min(_TILE_ROWS, _round_up(pl.cdiv(rows, 2), sub))
    grid = (pl.cdiv(rows, tile_rows),)                # ragged last block is clipped

    return pl.pallas_call(
        _step_kernel,
        out_shape=jax.ShapeDtypeStruct((rows, _LANES), jnp.float32),
        grid_spec=pltpu.PrefetchScalarGridSpec(
            num_scalar_prefetch=0,
            grid=grid,
            in_specs=[pl.BlockSpec((tile_rows, _LANES), lambda i: (i, 0))],
            out_specs=pl.BlockSpec((tile_rows, _LANES), lambda i: (i, 0)),
        ),
        compiler_params=_compiler_params(),
        cost_estimate=_cost(rows * _LANES, itemsize),
    )(x2d)


def _step_1d(x_flat: jax.Array) -> jax.Array:
    """Flat 1-D streaming pass with Pallas-clipped ragged last block (no pad)."""
    n = x_flat.shape[0]
    itemsize = jnp.dtype(x_flat.dtype).itemsize
    if n < 2 * 1024:
        tile = n                                      # single full-extent block
    else:
        tile = min(_TILE_1D, _round_up(pl.cdiv(n, 2), 1024))
    grid = (pl.cdiv(n, tile),)

    return pl.pallas_call(
        _step_kernel,
        out_shape=jax.ShapeDtypeStruct((n,), jnp.float32),
        grid_spec=pltpu.PrefetchScalarGridSpec(
            num_scalar_prefetch=0,
            grid=grid,
            in_specs=[pl.BlockSpec((tile,), lambda i: (i,))],
            out_specs=pl.BlockSpec((tile,), lambda i: (i,)),
        ),
        compiler_params=_compiler_params(),
        cost_estimate=_cost(n, itemsize),
    )(x_flat)


def step_forward(x: jax.Array) -> jax.Array:
    """Pallas equivalent of Step.forward: (x + eps >= 0).float()."""
    orig_shape = x.shape
    n = x.size
    if n == 0:
        return jnp.zeros(orig_shape, dtype=jnp.float32)

    x_flat = x.reshape(-1)  # contiguous flatten: bitcast, no HBM pass
    if n % _LANES == 0:
        out = _step_2d(x_flat.reshape(n // _LANES, _LANES))
    else:
        out = _step_1d(x_flat)
    return out.reshape(orig_shape)


if __name__ == "__main__":
    key = jax.random.PRNGKey(0)
    # Small NCHW-shaped input, consistent with a typical conv-style tensor.
    x = jax.random.normal(key, (2, 4, 16, 16), dtype=jnp.float32)

    out = step_forward(x)
    jax.block_until_ready(out)

    ref = (x + EPSILON >= 0).astype(jnp.float32)
    assert out.shape == x.shape
    assert out.dtype == jnp.float32
    assert bool(jnp.all(out == ref))

    # Ragged-size input (n % 512 != 0) exercises the 1-D clipped-block path.
    x2 = jax.random.normal(jax.random.PRNGKey(1), (5, 13, 37), dtype=jnp.float32)
    out2 = step_forward(x2)
    jax.block_until_ready(out2)
    ref2 = (x2 + EPSILON >= 0).astype(jnp.float32)
    assert out2.shape == x2.shape and out2.dtype == jnp.float32
    assert bool(jnp.all(out2 == ref2))

    print("KERNEL_OK")
</pallas_src>

<mosaic_0001>
module attributes {stable_mosaic.version = 11 : i64} {
  func.func @_step_kernel(%arg0: i32, %arg1: memref<4x512xf32, #tpu.memory_space<vmem>>, %arg2: memref<4x512xf32, #tpu.memory_space<vmem>>) attributes {dimension_semantics = [#tpu.dimension_semantics<parallel>], iteration_bounds = array<i64: 1>, scalar_prefetch = 0 : i64, scratch_operands = 0 : i64, tpu.core_type = #tpu.core_type<tc>, window_params = [{transform_indices = @transform_0, window_bounds = array<i64: 4, 512>}, {transform_indices = @transform_1, window_bounds = array<i64: 4, 512>}]} {
    %c0 = arith.constant 0 : index
    %c0_0 = arith.constant 0 : index
    %0 = vector.load %arg1[%c0, %c0_0] : memref<4x512xf32, #tpu.memory_space<vmem>>, vector<4x512xf32>
    %cst = arith.constant 1.000000e-10 : f32
    %1 = vector.broadcast %cst : f32 to vector<4x512xf32>
    %2 = arith.addf %0, %1 : vector<4x512xf32>
    %cst_1 = arith.constant 0.000000e+00 : f32
    %3 = vector.broadcast %cst_1 : f32 to vector<4x512xf32>
    %4 = arith.cmpf oge, %2, %3 : vector<4x512xf32>
    %5 = arith.extui %4 : vector<4x512xi1> to vector<4x512xi32>
    %6 = arith.sitofp %5 : vector<4x512xi32> to vector<4x512xf32>
    %c0_2 = arith.constant 0 : index
    %c0_3 = arith.constant 0 : index
    %7 = vector.load %arg2[%c0_2, %c0_3] : memref<4x512xf32, #tpu.memory_space<vmem>>, vector<4x512xf32>
    tpu.vector_store %arg2[%c0_2, %c0_3], %6 {strides = array<i32>} : memref<4x512xf32, #tpu.memory_space<vmem>>, vector<4x512xf32>,
    return
  }
  func.func @transform_0(%arg0: i32) -> (i32, i32) {
    %c0_i32 = arith.constant 0 : i32
    %c0_i32_0 = arith.constant 0 : i32
    return %arg0, %c0_i32 : i32, i32
  }
  func.func @transform_1(%arg0: i32) -> (i32, i32) {
    %c0_i32 = arith.constant 0 : i32
    %c0_i32_0 = arith.constant 0 : i32
    return %arg0, %c0_i32 : i32, i32
  }
}

</mosaic_0001>

<bundles_post_ra>
// kernel: tpu_custom_call.1
= control target key start
LH: loop header
LB: loop body
LE: loop exit
PB: predicated region body
PF: predicated region fallthrough
CT: control target
= control target key end

     0   :  { %6 = vsyncpa [#allocation3], 0  ;;  %s128_s0 = inlined_call_operand.hbm [shape: f32[4,512], index: 0, kind: input, shape index: {}]   ;;  %s129_s1 = inlined_call_operand.hbm [shape: f32[4,512], index: 1, kind: output, shape index: {}]  }
   0x1   :  { %7 = vsyncpa [#allocation4], 0  ;;  %s13_s8 = sshll.u32 %s128_s0, 4  ;;  %s109_s9 = smov [#allocation2]   ;;  %s14_s8 = int_to_ptr.hbm [resolvable:$true] %s13_s8 }
   0x2   :  { %s15_s10 = sshll.u32 %s109_s9, 4  ;;  %s16_s10 = int_to_ptr.vmem [resolvable:$true] %s15_s10 }
   0x3   :  { %18 = dma.hbm_to_vmem [thread:$0]  %s14_s8, 256, %s16_s10, [#allocation3]  }
   0x4   :  { %105 = dma.done.wait [#allocation3], 256  }
   0x5   :  { %106 = vsyncadd [#allocation3], 4294967040  ;;  %v23_v0 = vld [vmem:[#allocation2] sm:$0xff]  ;;  %v24_v1 = vld [vmem:[#allocation2 + $0x8] sm:$0xff]  ;;  %s110_s11 = smov [#allocation5]   ;;  %s42_s15 = sshll.u32 %s129_s1, 4  ;;  %s43_s15 = int_to_ptr.hbm [resolvable:$true] %s42_s15 }
   0x6   :  { %v25_v2 = vadd.f32 1e-10, %v23_v0  ;;  %v26_v3 = vadd.f32 1e-10, %v24_v1  ;;  %s40_s12 = sshll.u32 %s110_s11, 4  ;;  %v111_v4 = vmov 0.0   ;;  %s41_s12 = int_to_ptr.vmem [resolvable:$true] %s40_s12 }
   0x8   :  { %vm27_vm0 = vcmp.ge.f32.partialorder %v25_v2, 0.0  ;;  %vm28_vm1 = vcmp.ge.f32.partialorder %v26_v3, 0.0 }
   0x9   :  { %v52_v5 = vsel %vm27_vm0, 1.0, %v111_v4  ;;  %v53_v6 = vsel %vm28_vm1, 1.0, %v111_v4 }
   0xa   :  { %33 = vst [vmem:[#allocation5] sm:$0xff] %v52_v5 }
   0xb   :  { %34 = vst [vmem:[#allocation5 + $0x8] sm:$0xff] %v53_v6 }
   0xc   :  { %45 = dma.vmem_to_hbm [thread:$0]  %s41_s12, 256, %s43_s15, [#allocation4]  }
   0xd   :  { %107 = dma.done.wait [#allocation4], 256  }
   0xe   :  { %108 = vsyncadd [#allocation4], 4294967040 }
   0xf   :  { %50 = vsyncpa [#allocation3], 1 }
  0x10   :  { %51 = vsyncpa [#allocation4], 1 }

</bundles_post_ra>
